<compile_context>
chip_gen: v5e
topology: v5e:2x2
jax: 0.10.0
libtpu: 0.0.40
codegen_flags: <defaults>
</compile_context>

<pallas_src>
import jax
import jax.numpy as jnp
from jax.experimental import pallas as pl
from jax.experimental.pallas import tpu as pltpu

_LANES = 128  # TPU lane width; keeps the second matmul / output store lane-dense.


def _round_up(x, m):
    return ((x + m - 1) // m) * m


def mlp_kernel(x_ref, w1_ref, b1_ref, w2_ref, b2_ref, o_ref):
    """One batch tile of sigmoid(relu(x @ w1 + b1) @ w2 + b2).

    x_ref:  (TB, D)      compute dtype (bf16 or f32), pipelined over batch
    w1_ref: (D, H)       compute dtype, resident across all batch tiles
    b1_ref: (1, H)       f32, resident
    w2_ref: (H, 128)     compute dtype, real weight in column 0, rest zeros
    b2_ref: (1, 1)       f32, SMEM scalar
    o_ref:  (TB, 128)    f32, column 0 carries the result (lane-dense store)
    """
    # linear1 on the MXU, f32 accumulation.
    h = jnp.dot(x_ref[...], w1_ref[...], preferred_element_type=jnp.float32)
    # bias + ReLU in f32 on the VPU (v5e-safe).
    h = jnp.maximum(h + b1_ref[...], 0.0)
    # linear2: padded to 128 output lanes -> full-width MXU + unmasked store.
    out = jnp.dot(h.astype(w2_ref.dtype), w2_ref[...],
                  preferred_element_type=jnp.float32)
    out = out + b2_ref[0, 0]            # scalar bias straight from SMEM
    o_ref[...] = jax.nn.sigmoid(out).astype(o_ref.dtype)  # sigmoid -> EUP


def _vmem_limit_bytes(tb, d, h, cdt_bytes):
    # Conservative: double-buffered x & out tiles, resident weights, f32
    # intermediates; clamp to [32 MiB, 64 MiB] so the request is always legal
    # on v7x (64 MiB physical VMEM per TC).
    est = (2 * tb * d * cdt_bytes          # x tiles (double-buffered)
           + d * h * cdt_bytes             # w1 (resident)
           + h * _LANES * cdt_bytes        # padded w2 (resident)
           + 8 * _LANES * 4                # b1 (one (8,128) tile)
           + 2 * tb * _LANES * 4           # out tiles (double-buffered)
           + 2 * tb * h * 4)               # f32 intermediates
    return max(32 * 1024 * 1024, min(2 * est, 64 * 1024 * 1024))


def neural_net1_forward(x, w1, b1, w2, b2, *, block_b=512,
                        compute_dtype=jnp.bfloat16):
    """Full forward pass in one Pallas kernel, gridded over the batch.

    x:  (B, D) float32
    w1: (D, H) float32, b1: (1, H) float32
    w2: (H, 1) float32, b2: (1, 1) float32
    returns (B, 1) float32 probabilities.
    """
    B, D = x.shape
    H = w1.shape[1]

    # Batch tile: multiple of 8 sublanes; pad B to a whole number of tiles.
    tb = min(block_b, _round_up(B, 8))
    b_pad = _round_up(B, tb)
    if b_pad != B:
        x = jnp.pad(x, ((0, b_pad - B), (0, 0)))

    # Lane-dense second-layer weight: (H, 1) -> (H, 128), column 0 is real.
    w2p = jnp.zeros((H, _LANES), w2.dtype).at[:, 0:1].set(w2)

    # bf16 operands for the MXU (halves HBM/VMEM traffic on v6e/v7x);
    # biases and accumulation stay f32.
    xc = x.astype(compute_dtype)
    w1c = w1.astype(compute_dtype)
    w2c = w2p.astype(compute_dtype)
    b1f = b1.astype(jnp.float32)
    b2f = b2.astype(jnp.float32)

    cdt_bytes = jnp.dtype(compute_dtype).itemsize
    grid = (b_pad // tb,)

    out = pl.pallas_call(
        mlp_kernel,
        out_shape=jax.ShapeDtypeStruct((b_pad, _LANES), jnp.float32),
        grid=grid,
        in_specs=[
            pl.BlockSpec((tb, D), lambda i: (i, 0)),       # x: tiled over batch
            pl.BlockSpec((D, H), lambda i: (0, 0)),        # w1: resident
            pl.BlockSpec((1, H), lambda i: (0, 0)),        # b1: resident
            pl.BlockSpec((H, _LANES), lambda i: (0, 0)),   # padded w2: resident
            pl.BlockSpec(memory_space=pltpu.SMEM),         # b2: SMEM scalar
        ],
        out_specs=pl.BlockSpec((tb, _LANES), lambda i: (i, 0)),
        compiler_params=pltpu.CompilerParams(
            dimension_semantics=("parallel",),
            vmem_limit_bytes=_vmem_limit_bytes(tb, D, H, cdt_bytes),
        ),
    )(xc, w1c, b1f, w2c, b2f)

    # Strip batch padding and the 127 zero-weight lanes.
    return out[:B, 0:1]


def init_params(key, input_size, hidden_size):
    """Deterministic init mimicking nn.Linear's U(-1/sqrt(fan_in), 1/sqrt(fan_in))."""
    k1, k2, k3, k4 = jax.random.split(key, 4)
    bound1 = 1.0 / jnp.sqrt(jnp.float32(input_size))
    bound2 = 1.0 / jnp.sqrt(jnp.float32(hidden_size))
    w1 = jax.random.uniform(k1, (input_size, hidden_size), jnp.float32, -bound1, bound1)
    b1 = jax.random.uniform(k2, (1, hidden_size), jnp.float32, -bound1, bound1)
    w2 = jax.random.uniform(k3, (hidden_size, 1), jnp.float32, -bound2, bound2)
    b2 = jax.random.uniform(k4, (1, 1), jnp.float32, -bound2, bound2)
    return w1, b1, w2, b2


if __name__ == "__main__":
    batch = 8
    input_size = 32
    hidden_size = 32

    key = jax.random.PRNGKey(0)
    kx, kp = jax.random.split(key)
    x = jax.random.normal(kx, (batch, input_size), dtype=jnp.float32)
    w1, b1, w2, b2 = init_params(kp, input_size, hidden_size)

    # Pure-JAX f32 reference.
    y_ref = jax.nn.sigmoid(jnp.maximum(x @ w1 + b1, 0.0) @ w2 + b2)

    # f32 compute path: tight correctness check.
    y_f32 = neural_net1_forward(x, w1, b1, w2, b2, compute_dtype=jnp.float32)
    jax.block_until_ready(y_f32)
    assert y_f32.shape == (batch, 1)
    assert jnp.allclose(y_f32, y_ref, atol=1e-5, rtol=1e-5)

    # Default bf16 MXU path (fast path on v6e/v7x): looser check vs f32 ref.
    y_bf16 = neural_net1_forward(x, w1, b1, w2, b2)
    jax.block_until_ready(y_bf16)
    assert y_bf16.shape == (batch, 1)
    assert jnp.allclose(y_bf16, y_ref, atol=2e-2, rtol=2e-2)

    print("KERNEL_OK")
</pallas_src>

<mosaic_0001>
module attributes {stable_mosaic.version = 11 : i64} {
  func.func @mlp_kernel(%arg0: i32, %arg1: memref<8x32xf32, #tpu.memory_space<vmem>>, %arg2: memref<32x32xf32, #tpu.memory_space<vmem>>, %arg3: memref<1x32xf32, #tpu.memory_space<vmem>>, %arg4: memref<32x128xf32, #tpu.memory_space<vmem>>, %arg5: memref<1x1xf32, #tpu.memory_space<smem>>, %arg6: memref<8x128xf32, #tpu.memory_space<vmem>>) attributes {dimension_semantics = [#tpu.dimension_semantics<parallel>], iteration_bounds = array<i64: 1>, scalar_prefetch = 0 : i64, scratch_operands = 0 : i64, tpu.core_type = #tpu.core_type<tc>, window_params = [{transform_indices = @transform_0, window_bounds = array<i64: 8, 32>}, {pipeline_mode = #tpu.pipeline_mode<synchronous>, transform_indices = @transform_1, window_bounds = array<i64: 32, 32>}, {pipeline_mode = #tpu.pipeline_mode<synchronous>, transform_indices = @transform_2, window_bounds = array<i64: 1, 32>}, {pipeline_mode = #tpu.pipeline_mode<synchronous>, transform_indices = @transform_3, window_bounds = array<i64: 32, 128>}, {transform_indices = @transform_4, window_bounds = array<i64: 1, 1>}, {transform_indices = @transform_5, window_bounds = array<i64: 8, 128>}]} {
    %c0 = arith.constant 0 : index
    %c0_0 = arith.constant 0 : index
    %0 = vector.load %arg1[%c0, %c0_0] : memref<8x32xf32, #tpu.memory_space<vmem>>, vector<8x32xf32>
    %c0_1 = arith.constant 0 : index
    %c0_2 = arith.constant 0 : index
    %1 = vector.load %arg2[%c0_1, %c0_2] : memref<32x32xf32, #tpu.memory_space<vmem>>, vector<32x32xf32>
    %cst = arith.constant dense<0.000000e+00> : vector<8x32xf32>
    %2 = tpu.matmul %0, %1, %cst {dimension_numbers = #tpu.dot_dimension_numbers<[1], [0], [0], [1], [0, 0, 1, 1], [], []>} : vector<8x32xf32>, vector<32x32xf32>, vector<8x32xf32> -> vector<8x32xf32>
    %c0_3 = arith.constant 0 : index
    %c0_4 = arith.constant 0 : index
    %3 = vector.load %arg3[%c0_3, %c0_4] : memref<1x32xf32, #tpu.memory_space<vmem>>, vector<1x32xf32>
    %4 = vector.broadcast %3 : vector<1x32xf32> to vector<8x32xf32>
    %5 = arith.addf %2, %4 : vector<8x32xf32>
    %cst_5 = arith.constant 0.000000e+00 : f32
    %6 = vector.broadcast %cst_5 : f32 to vector<8x32xf32>
    %7 = arith.maximumf %5, %6 : vector<8x32xf32>
    %c0_6 = arith.constant 0 : index
    %c0_7 = arith.constant 0 : index
    %8 = vector.load %arg4[%c0_6, %c0_7] : memref<32x128xf32, #tpu.memory_space<vmem>>, vector<32x128xf32>
    %cst_8 = arith.constant dense<0.000000e+00> : vector<8x128xf32>
    %9 = tpu.matmul %7, %8, %cst_8 {dimension_numbers = #tpu.dot_dimension_numbers<[1], [0], [0], [1], [0, 0, 1, 1], [], []>} : vector<8x32xf32>, vector<32x128xf32>, vector<8x128xf32> -> vector<8x128xf32>
    %c0_9 = arith.constant 0 : index
    %c0_10 = arith.constant 0 : index
    %10 = memref.load %arg5[%c0_9, %c0_10] : memref<1x1xf32, #tpu.memory_space<smem>>
    %11 = vector.broadcast %10 : f32 to vector<8x128xf32>
    %12 = arith.addf %9, %11 : vector<8x128xf32>
    %13 = arith.negf %12 : vector<8x128xf32>
    %14 = math.exp %13 : vector<8x128xf32>
    %cst_11 = arith.constant 1.000000e+00 : f32
    %15 = vector.broadcast %cst_11 : f32 to vector<8x128xf32>
    %16 = arith.addf %15, %14 : vector<8x128xf32>
    %17 = arith.divf %15, %16 : vector<8x128xf32>
    %c0_12 = arith.constant 0 : index
    %c0_13 = arith.constant 0 : index
    %18 = vector.load %arg6[%c0_12, %c0_13] : memref<8x128xf32, #tpu.memory_space<vmem>>, vector<8x128xf32>
    tpu.vector_store %arg6[%c0_12, %c0_13], %17 {strides = array<i32>} : memref<8x128xf32, #tpu.memory_space<vmem>>, vector<8x128xf32>,
    return
  }
  func.func @transform_0(%arg0: i32) -> (i32, i32) {
    %c0_i32 = arith.constant 0 : i32
    %c0_i32_0 = arith.constant 0 : i32
    return %arg0, %c0_i32 : i32, i32
  }
  func.func @transform_1(%arg0: i32) -> (i32, i32) {
    %c0_i32 = arith.constant 0 : i32
    %c0_i32_0 = arith.constant 0 : i32
    %c0_i32_1 = arith.constant 0 : i32
    return %c0_i32, %c0_i32_0 : i32, i32
  }
  func.func @transform_2(%arg0: i32) -> (i32, i32) {
    %c0_i32 = arith.constant 0 : i32
    %c0_i32_0 = arith.constant 0 : i32
    %c0_i32_1 = arith.constant 0 : i32
    return %c0_i32, %c0_i32_0 : i32, i32
  }
  func.func @transform_3(%arg0: i32) -> (i32, i32) {
    %c0_i32 = arith.constant 0 : i32
    %c0_i32_0 = arith.constant 0 : i32
    %c0_i32_1 = arith.constant 0 : i32
    return %c0_i32, %c0_i32_0 : i32, i32
  }
  func.func @transform_4(%arg0: i32) -> (i32, i32) {
    %c0_i32 = arith.constant 0 : i32
    %c0_i32_0 = arith.constant 0 : i32
    %c0_i32_1 = arith.constant 0 : i32
    return %c0_i32, %c0_i32_0 : i32, i32
  }
  func.func @transform_5(%arg0: i32) -> (i32, i32) {
    %c0_i32 = arith.constant 0 : i32
    %c0_i32_0 = arith.constant 0 : i32
    return %arg0, %c0_i32 : i32, i32
  }
}

</mosaic_0001>

<bundles_post_ra>
// kernel: tpu_custom_call.1
= control target key start
LH: loop header
LB: loop body
LE: loop exit
PB: predicated region body
PF: predicated region fallthrough
CT: control target
= control target key end

     0   :  { %11 = vsyncpa [#allocation4], 0  ;;  %s338_s0 = inlined_call_operand.hbm [shape: f32[8,32], index: 0, kind: input, shape index: {}]   ;;  %s339_s1 = inlined_call_operand.hbm [shape: f32[32,32], index: 1, kind: input, shape index: {}]   ;;  %s340_s2 = inlined_call_operand.vmem [shape: f32[1,32], index: 2, kind: input, shape index: {}]   ;;  %s341_s3 = inlined_call_operand.hbm [shape: f32[32,128], index: 3, kind: input, shape index: {}]   ;;  %s342_s4 = inlined_call_operand.<no memory space> [shape: f32[1,1], index: 4, kind: input, shape index: {}]   ;;  %s343_s5 = inlined_call_operand.hbm [shape: f32[8,128], index: 5, kind: output, shape index: {}]  }
   0x1   :  { %12 = vsyncpa [#allocation7], 0  ;;  %s29_s20 = sshll.u32 %s339_s1, 4  ;;  %s30_s20 = int_to_ptr.hbm [resolvable:$true] %s29_s20 }
   0x2   :  { %13 = vsyncpa [#allocation5], 0  ;;  %s284_s21 = smov [#allocation6]   ;;  %s19_s25 = sshll.u32 %s338_s0, 4  ;;  %s20_s25 = int_to_ptr.hbm [resolvable:$true] %s19_s25 }
   0x3   :  { %s31_s22 = sshll.u32 %s284_s21, 4  ;;  %s285_s26 = smov 128   ;;  %s32_s22 = int_to_ptr.vmem [resolvable:$true] %s31_s22 }
   0x4   :  { %s286_s27 = smov 8   ;;  %s287_s28 = smov [#allocation3]  }
   0x5   :  { %37 = dma.hbm_to_vmem [thread:$0]  %s30_s20, 512, %s32_s22, [#allocation7], %s285_s26, %s285_s26, %s286_s27  }
   0x6   :  { %s21_s29 = sshll.u32 %s287_s28, 4  ;;  %s44_s7 = sshll.u32 %s341_s3, 4  ;;  %s22_s29 = int_to_ptr.vmem [resolvable:$true] %s21_s29  ;;  %s45_s7 = int_to_ptr.hbm [resolvable:$true] %s44_s7 }
   0x7   :  { %24 = dma.hbm_to_vmem [thread:$0]  %s20_s25, 128, %s22_s29, [#allocation4]  }
   0x8   :  { %s288_s1 = smov [#allocation8]  }
   0x9   :  { %s46_s8 = sshll.u32 %s288_s1, 4  ;;  %s47_s8 = int_to_ptr.vmem [resolvable:$true] %s46_s8 }
   0xa   :  { %52 = dma.hbm_to_vmem [thread:$0]  %s45_s7, 512, %s47_s8, [#allocation7], %s285_s26, %s285_s26, %s286_s27  }
   0xb   :  { %278 = dma.done.wait [#allocation4], 128  }
   0xc   :  { %279 = vsyncadd [#allocation4], 4294967168 }
   0xd   :  { %280 = dma.done.wait [#allocation7], 1024  }
   0xe   :  { %281 = vsyncadd [#allocation7], 4294966272  ;;  %v71_v0 = vld [vmem:[#allocation6 + $0x18] sm:$0xff]  ;;  %v70_v1 = vld [vmem:[#allocation6 + $0x10] sm:$0xff]  ;;  %vm76_vm0 = vcmask 261120   ;;  %v106_v13 = vstv %s342_s4  ;;  %s157_s4 = sshll.u32 %s343_s5, 4  ;;  %s158_s4 = int_to_ptr.hbm [resolvable:$true] %s157_s4 }
   0xf   :  { %92 = vmatpush.msra.mxu0 %v71_v0  ;;  %v104_v2 = vld [vmem:[#allocation8 + $0x18] sm:$0xff]  ;;  %v69_v3 = vld [vmem:[#allocation6 + $0x8] sm:$0xff]  ;;  %v68_v4 = vld [vmem:[#allocation6] sm:$0xff] }
  0x10   :  { %122 = vmatpush.msra.mxu1 %v104_v2  ;;  %v67_v5 = vld [vmem:[#allocation3] sm:$0xff]  ;;  %v103_v6 = vld [vmem:[#allocation8 + $0x10] sm:$0xff]  ;;  %v102_v7 = vld [vmem:[#allocation8 + $0x8] sm:$0xff] }
  0x11   :  { %93 = vmatpush.msra.mxu0 %v70_v1  ;;  %v101_v8 = vld [vmem:[#allocation8] sm:$0xff]  ;;  %v177_v9 = vld [vmem:[%s340_s2] ss:$0 sm:$0xff]  ;;  %s289_s2 = smov [#allocation9]  }
  0x12   :  { %123 = vmatpush.msra.mxu1 %v103_v6  ;;  %s155_s11 = sshll.u32 %s289_s2, 4  ;;  %s156_s11 = int_to_ptr.vmem [resolvable:$true] %s155_s11 }
  0x13   :  { %94 = vmatpush.msra.mxu0 %v69_v3 }
  0x14   :  { %124 = vmatpush.msra.mxu1 %v102_v7 }
  0x15   :  { %95 = vmatpush.msra.mxu0 %v68_v4 }
  0x16   :  { %168 = vmatmul.msk.f32.vlgmr.msra.gmra.mxu0 %vm76_vm0, %v67_v5  ;;  %125 = vmatpush.msra.mxu1 %v101_v8 }
  0x93   :  { %v97_v10 = vpop.f32.mrf.mxu0 }
  0x94   :  { %v98_v11 = vadd.f32 %v177_v9, %v97_v10 }
  0x96   :  { %v100_v12 = vmax.f32 %v98_v11, 0.0 }
  0x98   :  { %169 = vmatmul.msk.f32.vlgmr.msra.gmra.mxu1 %vm76_vm0, %v100_v12 }
 0x115   :  { %v127_v14 = vpop.f32.mrf.mxu1 }
 0x116   :  { %v128_v15 = vadd.f32 %v127_v14, %v106_v13 }
 0x118   :  { %v170_v16 = vmul.f32 -1.442695, %v128_v15 }
 0x11a   :  { %178 = vpow2.f32 %v170_v16 }
 0x120   :  { %v179_v17 = vpop.eup %178 }
 0x121   :  { %v133_v18 = vadd.f32 1.0, %v179_v17 }
 0x123   :  { %180 = vrcp.f32 %v133_v18  ;;  %v145_v22 = vand.u32 2147483648, %v133_v18  ;;  %v143_v24 = vand.u32 2147483647, %v133_v18  ;;  %vm139_vm2 = vweird.f32 %v133_v18 }
 0x125   :  { %v146_v26 = vor.u32 1.1754944e-38, %v145_v22  ;;  %vm144_vm4 = vcmp.eq.f32.partialorder %v143_v24, 8.507059e+37 }
 0x129   :  { %v181_v19 = vpop.eup %180 }
 0x12a   :  { %v135_v20 = vmul.f32 %v181_v19, %v133_v18  ;;  %vm140_vm1 = vweird.f32 %v181_v19 }
 0x12b   :  { %vm141_vm3 = vmor %vm139_vm2, %vm140_vm1 }
 0x12c   :  { %v136_v21 = vsub.f32 1.0, %v135_v20 }
 0x12e   :  { %v137_v23 = vmul.f32 %v181_v19, %v136_v21 }
 0x130   :  { %v138_v25 = vadd.f32 %v181_v19, %v137_v23 }
 0x132   :  { %v142_v27 = vsel %vm141_vm3, %v181_v19, %v138_v25 }
 0x133   :  { %v147_v28 = vsel %vm144_vm4, %v146_v26, %v142_v27 }
 0x134   :  { %149 = vst [vmem:[#allocation9] sm:$0xff] %v147_v28 }
 0x135   :  { %160 = dma.vmem_to_hbm [thread:$0]  %s156_s11, 128, %s158_s4, [#allocation5]  }
 0x136   :  { %282 = dma.done.wait [#allocation5], 128  }
 0x137   :  { %283 = vsyncadd [#allocation5], 4294967168 }
 0x138   :  { %165 = vsyncpa [#allocation4], 1 }
 0x139   :  { %166 = vsyncpa [#allocation7], 1 }
 0x13a   :  { %167 = vsyncpa [#allocation5], 1 }

</bundles_post_ra>
